<compile_context>
chip_gen: v7x
topology: tpu7x:2x2x1
jax: 0.10.0
libtpu: 0.0.40
codegen_flags: <defaults>
</compile_context>

<pallas_src>
import jax
import jax.numpy as jnp
from jax.experimental import pallas as pl
from jax.experimental.pallas import tpu as pltpu

_NPAD = 16  # lane-padded class dimension (real classes = 10)


def _mlp_kernel(x_ref, w1_ref, b1_ref, w2_ref, b2_ref, w3_ref, b3_ref, o_ref):
    # x_ref: (TB, 512) f32 tile read from HBM; cast to bf16 on the VPU only for
    # the fc1 MXU dot (f32 accumulate).  Weights are full resident blocks.
    x = x_ref[...].astype(jnp.bfloat16)

    # fc1 (bf16 x bf16 -> f32 accumulate) + ReLU (f32 on VPU)
    h1 = jnp.dot(x, w1_ref[...], preferred_element_type=jnp.float32) + b1_ref[...]
    h1 = jnp.maximum(h1, 0.0)

    # fc2 + ReLU (f32 throughout)
    h2 = jnp.dot(h1, w2_ref[...], preferred_element_type=jnp.float32) + b2_ref[...]
    h2 = jnp.maximum(h2, 0.0)

    # fc3 into a 16-lane slab.  Pad lanes of b3 hold -1e30 (and pad weights are
    # 0) so exp() underflows to exactly 0 and the log-softmax over the real 10
    # classes is unchanged.
    logits = jnp.dot(h2, w3_ref[...], preferred_element_type=jnp.float32) + b3_ref[...]

    # log_softmax over the class axis (lane axis)
    m = jnp.max(logits, axis=-1, keepdims=True)
    shifted = logits - m
    lse = jnp.log(jnp.sum(jnp.exp(shifted), axis=-1, keepdims=True))
    o_ref[...] = (shifted - lse).astype(o_ref.dtype)


def mlp_forward(x_nchw, params, *, tb=4096):
    """x_nchw: (B, 512, 1, 1) float32.  Returns (B, 10) log-probabilities."""
    w1, b1, w2, b2, w3, b3 = params  # weights stored (in_features, out_features)
    B = x_nchw.shape[0]

    # Flatten exactly like torch's x.view(-1, 512).  Keep f32 (no extra HBM pass).
    x = x_nchw.reshape(B, 512)
    w1b = w1.astype(jnp.bfloat16)  # tiny, one-time

    # Pad the final layer 10 -> 16 classes (weights 0, bias -1e30 on pad lanes).
    w3p = jnp.pad(w3, ((0, 0), (0, _NPAD - w3.shape[1])))
    b3p = jnp.pad(b3, ((0, 0), (0, _NPAD - b3.shape[1])), constant_values=-1e30)

    # Batch tiling.  Large tiles amortize per-grid-step overhead; for medium
    # batches split into 2 tiles so both v7x TensorCores get work.  No padding
    # of x: Pallas masks the ragged final block.
    if B <= tb:
        if B > 1024:
            TB = ((pl.cdiv(B, 2) + 7) // 8) * 8   # two (near-)balanced steps
        else:
            TB = B                                 # single tile == full batch dim
    else:
        TB = tb
    grid = (pl.cdiv(B, TB),)

    weights_bytes = 512 * 30 * 2 + (30 * 30 + 30 * _NPAD + 30 + 30 + _NPAD) * 4
    vmem_bytes = 2 * TB * (512 + _NPAD) * 4 + weights_bytes + (4 << 20)
    vmem_bytes = min(int(vmem_bytes), 96 * 1024 * 1024)

    cost = pl.CostEstimate(
        flops=2 * B * (512 * 30 + 30 * 30 + 30 * _NPAD),
        transcendentals=B * (_NPAD + 1),
        bytes_accessed=(B * 512 * 4          # x (f32)
                        + B * _NPAD * 4      # output slab (f32)
                        + weights_bytes),
    )

    out = pl.pallas_call(
        _mlp_kernel,
        out_shape=jax.ShapeDtypeStruct((B, _NPAD), jnp.float32),
        grid=grid,
        in_specs=[
            pl.BlockSpec((TB, 512), lambda i: (i, 0)),     # x tiles (pipelined)
            pl.BlockSpec((512, 30), lambda i: (0, 0)),     # w1 (bf16, resident)
            pl.BlockSpec((1, 30),   lambda i: (0, 0)),     # b1
            pl.BlockSpec((30, 30),  lambda i: (0, 0)),     # w2
            pl.BlockSpec((1, 30),   lambda i: (0, 0)),     # b2
            pl.BlockSpec((30, _NPAD), lambda i: (0, 0)),   # w3 (16-lane padded)
            pl.BlockSpec((1, _NPAD),  lambda i: (0, 0)),   # b3 (16-lane padded)
        ],
        out_specs=pl.BlockSpec((TB, _NPAD), lambda i: (i, 0)),
        compiler_params=pltpu.CompilerParams(
            dimension_semantics=("parallel",),
            vmem_limit_bytes=vmem_bytes,
        ),
        cost_estimate=cost,
    )(x, w1b, b1, w2, b2, w3p, b3p)

    return out[:, :10]


def init_params(key):
    """Deterministic init mirroring torch.nn.Linear default (uniform +-1/sqrt(fan_in)).
    Weights are stored as (in_features, out_features)."""
    ks = jax.random.split(key, 6)

    def linear(kw, kb, fan_in, fan_out):
        bound = 1.0 / jnp.sqrt(fan_in)
        w = jax.random.uniform(kw, (fan_in, fan_out), jnp.float32, -bound, bound)
        b = jax.random.uniform(kb, (1, fan_out), jnp.float32, -bound, bound)
        return w, b

    w1, b1 = linear(ks[0], ks[1], 512, 30)
    w2, b2 = linear(ks[2], ks[3], 30, 30)
    w3, b3 = linear(ks[4], ks[5], 30, 10)
    return (w1, b1, w2, b2, w3, b3)


if __name__ == "__main__":
    key = jax.random.PRNGKey(0)
    kx, kp = jax.random.split(key)

    # Small batch; channel dim must be 512 to match Linear(512*1*1, 30).
    x = jax.random.normal(kx, (2, 512, 1, 1), jnp.float32)
    params = init_params(kp)

    out = mlp_forward(x, params)
    out = jax.block_until_ready(out)

    # Reference: same forward pass in pure JAX.  x/w1 are rounded to bf16 for
    # fc1 to match the kernel's bf16 MXU operands (f32 accumulate in both).
    w1, b1, w2, b2, w3, b3 = params
    xf = x.reshape(x.shape[0], -1).astype(jnp.bfloat16).astype(jnp.float32)
    w1f = w1.astype(jnp.bfloat16).astype(jnp.float32)
    h1 = jnp.maximum(xf @ w1f + b1, 0.0)
    h2 = jnp.maximum(h1 @ w2 + b2, 0.0)
    ref = jax.nn.log_softmax(h2 @ w3 + b3, axis=1)

    assert out.shape == (2, 10)
    assert jnp.allclose(out, ref, atol=1e-3, rtol=1e-3), (
        float(jnp.max(jnp.abs(out - ref))))

    print("KERNEL_OK")
</pallas_src>

<mosaic_0001>
module attributes {stable_mosaic.version = 11 : i64} {
  func.func @_mlp_kernel(%arg0: i32, %arg1: memref<2x512xf32, #tpu.memory_space<vmem>>, %arg2: memref<512x30xbf16, #tpu.memory_space<vmem>>, %arg3: memref<1x30xf32, #tpu.memory_space<vmem>>, %arg4: memref<30x30xf32, #tpu.memory_space<vmem>>, %arg5: memref<1x30xf32, #tpu.memory_space<vmem>>, %arg6: memref<30x16xf32, #tpu.memory_space<vmem>>, %arg7: memref<1x16xf32, #tpu.memory_space<vmem>>, %arg8: memref<2x16xf32, #tpu.memory_space<vmem>>) attributes {dimension_semantics = [#tpu.dimension_semantics<parallel>], iteration_bounds = array<i64: 1>, scalar_prefetch = 0 : i64, scratch_operands = 0 : i64, tpu.core_type = #tpu.core_type<tc>, window_params = [{transform_indices = @transform_0, window_bounds = array<i64: 2, 512>}, {pipeline_mode = #tpu.pipeline_mode<synchronous>, transform_indices = @transform_1, window_bounds = array<i64: 512, 30>}, {pipeline_mode = #tpu.pipeline_mode<synchronous>, transform_indices = @transform_2, window_bounds = array<i64: 1, 30>}, {pipeline_mode = #tpu.pipeline_mode<synchronous>, transform_indices = @transform_3, window_bounds = array<i64: 30, 30>}, {pipeline_mode = #tpu.pipeline_mode<synchronous>, transform_indices = @transform_4, window_bounds = array<i64: 1, 30>}, {pipeline_mode = #tpu.pipeline_mode<synchronous>, transform_indices = @transform_5, window_bounds = array<i64: 30, 16>}, {pipeline_mode = #tpu.pipeline_mode<synchronous>, transform_indices = @transform_6, window_bounds = array<i64: 1, 16>}, {transform_indices = @transform_7, window_bounds = array<i64: 2, 16>}]} {
    %c0 = arith.constant 0 : index
    %c0_0 = arith.constant 0 : index
    %0 = vector.load %arg1[%c0, %c0_0] : memref<2x512xf32, #tpu.memory_space<vmem>>, vector<2x512xf32>
    %1 = arith.truncf %0 : vector<2x512xf32> to vector<2x512xbf16>
    %c0_1 = arith.constant 0 : index
    %c0_2 = arith.constant 0 : index
    %2 = vector.load %arg2[%c0_1, %c0_2] : memref<512x30xbf16, #tpu.memory_space<vmem>>, vector<512x30xbf16>
    %cst = arith.constant dense<0.000000e+00> : vector<2x30xf32>
    %3 = tpu.matmul %1, %2, %cst {dimension_numbers = #tpu.dot_dimension_numbers<[1], [0], [0], [1], [0, 0, 1, 1], [], []>} : vector<2x512xbf16>, vector<512x30xbf16>, vector<2x30xf32> -> vector<2x30xf32>
    %c0_3 = arith.constant 0 : index
    %c0_4 = arith.constant 0 : index
    %4 = vector.load %arg3[%c0_3, %c0_4] : memref<1x30xf32, #tpu.memory_space<vmem>>, vector<1x30xf32>
    %5 = vector.broadcast %4 : vector<1x30xf32> to vector<2x30xf32>
    %6 = arith.addf %3, %5 : vector<2x30xf32>
    %cst_5 = arith.constant 0.000000e+00 : f32
    %7 = vector.broadcast %cst_5 : f32 to vector<2x30xf32>
    %8 = arith.maximumf %6, %7 : vector<2x30xf32>
    %c0_6 = arith.constant 0 : index
    %c0_7 = arith.constant 0 : index
    %9 = vector.load %arg4[%c0_6, %c0_7] : memref<30x30xf32, #tpu.memory_space<vmem>>, vector<30x30xf32>
    %cst_8 = arith.constant dense<0.000000e+00> : vector<2x30xf32>
    %10 = tpu.matmul %8, %9, %cst_8 {dimension_numbers = #tpu.dot_dimension_numbers<[1], [0], [0], [1], [0, 0, 1, 1], [], []>} : vector<2x30xf32>, vector<30x30xf32>, vector<2x30xf32> -> vector<2x30xf32>
    %c0_9 = arith.constant 0 : index
    %c0_10 = arith.constant 0 : index
    %11 = vector.load %arg5[%c0_9, %c0_10] : memref<1x30xf32, #tpu.memory_space<vmem>>, vector<1x30xf32>
    %12 = vector.broadcast %11 : vector<1x30xf32> to vector<2x30xf32>
    %13 = arith.addf %10, %12 : vector<2x30xf32>
    %cst_11 = arith.constant 0.000000e+00 : f32
    %14 = vector.broadcast %cst_11 : f32 to vector<2x30xf32>
    %15 = arith.maximumf %13, %14 : vector<2x30xf32>
    %c0_12 = arith.constant 0 : index
    %c0_13 = arith.constant 0 : index
    %16 = vector.load %arg6[%c0_12, %c0_13] : memref<30x16xf32, #tpu.memory_space<vmem>>, vector<30x16xf32>
    %cst_14 = arith.constant dense<0.000000e+00> : vector<2x16xf32>
    %17 = tpu.matmul %15, %16, %cst_14 {dimension_numbers = #tpu.dot_dimension_numbers<[1], [0], [0], [1], [0, 0, 1, 1], [], []>} : vector<2x30xf32>, vector<30x16xf32>, vector<2x16xf32> -> vector<2x16xf32>
    %c0_15 = arith.constant 0 : index
    %c0_16 = arith.constant 0 : index
    %18 = vector.load %arg7[%c0_15, %c0_16] : memref<1x16xf32, #tpu.memory_space<vmem>>, vector<1x16xf32>
    %19 = vector.broadcast %18 : vector<1x16xf32> to vector<2x16xf32>
    %20 = arith.addf %17, %19 : vector<2x16xf32>
    %cst_17 = arith.constant dense<0xFF800000> : vector<2xf32>
    %21 = vector.multi_reduction <maximumf>, %20, %cst_17 [1] : vector<2x16xf32> to vector<2xf32>
    %22 = vector.shape_cast %21 : vector<2xf32> to vector<2x1xf32>
    %23 = vector.broadcast %22 : vector<2x1xf32> to vector<2x16xf32>
    %24 = arith.subf %20, %23 : vector<2x16xf32>
    %25 = math.exp %24 : vector<2x16xf32>
    %cst_18 = arith.constant dense<0.000000e+00> : vector<2xf32>
    %26 = vector.multi_reduction <add>, %25, %cst_18 [1] : vector<2x16xf32> to vector<2xf32>
    %27 = vector.shape_cast %26 : vector<2xf32> to vector<2x1xf32>
    %28 = math.log %27 : vector<2x1xf32>
    %29 = vector.broadcast %28 : vector<2x1xf32> to vector<2x16xf32>
    %30 = arith.subf %24, %29 : vector<2x16xf32>
    %c0_19 = arith.constant 0 : index
    %c0_20 = arith.constant 0 : index
    %31 = vector.load %arg8[%c0_19, %c0_20] : memref<2x16xf32, #tpu.memory_space<vmem>>, vector<2x16xf32>
    tpu.vector_store %arg8[%c0_19, %c0_20], %30 {strides = array<i32>} : memref<2x16xf32, #tpu.memory_space<vmem>>, vector<2x16xf32>,
    return
  }
  func.func @transform_0(%arg0: i32) -> (i32, i32) {
    %c0_i32 = arith.constant 0 : i32
    %c0_i32_0 = arith.constant 0 : i32
    return %arg0, %c0_i32 : i32, i32
  }
  func.func @transform_1(%arg0: i32) -> (i32, i32) {
    %c0_i32 = arith.constant 0 : i32
    %c0_i32_0 = arith.constant 0 : i32
    %c0_i32_1 = arith.constant 0 : i32
    return %c0_i32, %c0_i32_0 : i32, i32
  }
  func.func @transform_2(%arg0: i32) -> (i32, i32) {
    %c0_i32 = arith.constant 0 : i32
    %c0_i32_0 = arith.constant 0 : i32
    %c0_i32_1 = arith.constant 0 : i32
    return %c0_i32, %c0_i32_0 : i32, i32
  }
  func.func @transform_3(%arg0: i32) -> (i32, i32) {
    %c0_i32 = arith.constant 0 : i32
    %c0_i32_0 = arith.constant 0 : i32
    %c0_i32_1 = arith.constant 0 : i32
    return %c0_i32, %c0_i32_0 : i32, i32
  }
  func.func @transform_4(%arg0: i32) -> (i32, i32) {
    %c0_i32 = arith.constant 0 : i32
    %c0_i32_0 = arith.constant 0 : i32
    %c0_i32_1 = arith.constant 0 : i32
    return %c0_i32, %c0_i32_0 : i32, i32
  }
  func.func @transform_5(%arg0: i32) -> (i32, i32) {
    %c0_i32 = arith.constant 0 : i32
    %c0_i32_0 = arith.constant 0 : i32
    %c0_i32_1 = arith.constant 0 : i32
    return %c0_i32, %c0_i32_0 : i32, i32
  }
  func.func @transform_6(%arg0: i32) -> (i32, i32) {
    %c0_i32 = arith.constant 0 : i32
    %c0_i32_0 = arith.constant 0 : i32
    %c0_i32_1 = arith.constant 0 : i32
    return %c0_i32, %c0_i32_0 : i32, i32
  }
  func.func @transform_7(%arg0: i32) -> (i32, i32) {
    %c0_i32 = arith.constant 0 : i32
    %c0_i32_0 = arith.constant 0 : i32
    return %arg0, %c0_i32 : i32, i32
  }
}

</mosaic_0001>

<bundles_post_ra>
// kernel: tpu_custom_call.1
= control target key start
LH: loop header
LB: loop body
LE: loop exit
PB: predicated region body
PF: predicated region fallthrough
CT: control target
= control target key end

     0   :  { %v34_v30 = vlaneseq  ;;  %s1001_s0 = inlined_call_operand.vmem [shape: f32[2,512], index: 0, kind: input, shape index: {}]   ;;  %s1002_s1 = inlined_call_operand.vmem [shape: bf16[512,30], index: 1, kind: input, shape index: {}]   ;;  %s1003_s2 = inlined_call_operand.vmem [shape: f32[1,30], index: 2, kind: input, shape index: {}]   ;;  %s1004_s3 = inlined_call_operand.vmem [shape: f32[30,30], index: 3, kind: input, shape index: {}]   ;;  %s1005_s4 = inlined_call_operand.vmem [shape: f32[1,30], index: 4, kind: input, shape index: {}]   ;;  %s1006_s5 = inlined_call_operand.vmem [shape: f32[30,16], index: 5, kind: input, shape index: {}]   ;;  %s1007_s6 = inlined_call_operand.vmem [shape: f32[1,16], index: 6, kind: input, shape index: {}]   ;;  %s1008_s7 = inlined_call_operand.hbm [shape: f32[2,16], index: 7, kind: output, shape index: {}]  }
   0x1   :  { %v739_v0 = vld [vmem:[%s1002_s1 + $0x40] sm:$0xff]   ;;  %v743_v4 = vld [vmem:[%s1002_s1 + $0x48] sm:$0xff]   ;;  %v747_v8 = vld [vmem:[%s1002_s1 + $0x50] sm:$0xff]  }
   0x2   :  { %v740_v1 = vld [vmem:[%s1002_s1 + $0xc0] sm:$0xff]   ;;  %643 = vmatprep.subr.bf16.mxu0 %v739_v0  ;;  %v744_v5 = vld [vmem:[%s1002_s1 + $0xc8] sm:$0xff]   ;;  %v748_v9 = vld [vmem:[%s1002_s1 + $0xd0] sm:$0xff]  }
   0x3   :  { %v741_v2 = vld [vmem:[%s1002_s1] sm:$0xff]   ;;  %665 = vmatprep.subr.bf16.mxu1 %v740_v1  ;;  %v745_v6 = vld [vmem:[%s1002_s1 + $0x8] sm:$0xff]   ;;  %v749_v10 = vld [vmem:[%s1002_s1 + $0x10] sm:$0xff]  }
   0x4   :  { %v742_v3 = vld [vmem:[%s1002_s1 + $0x80] sm:$0xff]   ;;  %644 = vmatpush3.bf16.msra.mxu0 %v741_v2  ;;  %v746_v7 = vld [vmem:[%s1002_s1 + $0x88] sm:$0xff]   ;;  %v750_v11 = vld [vmem:[%s1002_s1 + $0x90] sm:$0xff]  }
   0x5   :  { %666 = vmatpush3.bf16.msra.mxu1 %v742_v3  ;;  %645 = vmatprep.subr.bf16.mxu0 %v743_v4  ;;  %v751_v12 = vld [vmem:[%s1002_s1 + $0x58] sm:$0xff]   ;;  %v755_v16 = vld [vmem:[%s1002_s1 + $0x60] sm:$0xff]   ;;  %v759_v20 = vld [vmem:[%s1002_s1 + $0x68] sm:$0xff]  }
   0x6   :  { %667 = vmatprep.subr.bf16.mxu1 %v744_v5  ;;  %v752_v13 = vld [vmem:[%s1002_s1 + $0xd8] sm:$0xff]   ;;  %v756_v17 = vld [vmem:[%s1002_s1 + $0xe0] sm:$0xff]   ;;  %v760_v21 = vld [vmem:[%s1002_s1 + $0xe8] sm:$0xff]  }
   0x7   :  { %v753_v14 = vld [vmem:[%s1002_s1 + $0x18] sm:$0xff]   ;;  %v757_v18 = vld [vmem:[%s1002_s1 + $0x20] sm:$0xff]   ;;  %v761_v22 = vld [vmem:[%s1002_s1 + $0x28] sm:$0xff]  }
   0x8   :  { %646 = vmatpush3.bf16.msra.mxu0 %v745_v6  ;;  %v754_v15 = vld [vmem:[%s1002_s1 + $0x98] sm:$0xff]   ;;  %v758_v19 = vld [vmem:[%s1002_s1 + $0xa0] sm:$0xff]   ;;  %v762_v23 = vld [vmem:[%s1002_s1 + $0xa8] sm:$0xff]  }
   0x9   :  { %668 = vmatpush3.bf16.msra.mxu1 %v746_v7  ;;  %647 = vmatprep.subr.bf16.mxu0 %v747_v8  ;;  %v763_v24 = vld [vmem:[%s1002_s1 + $0x70] sm:$0xff]   ;;  %v767_v28 = vld [vmem:[%s1002_s1 + $0x78] sm:$0xff]   ;;  %v28_v33 = vld [vmem:[%s1001_s0] sm:$0xff] }
   0xa   :  { %669 = vmatprep.subr.bf16.mxu1 %v748_v9  ;;  %v764_v25 = vld [vmem:[%s1002_s1 + $0xf0] sm:$0xff]   ;;  %v768_v29 = vld [vmem:[%s1002_s1 + $0xf8] sm:$0xff]  }
   0xb   :  { %v765_v26 = vld [vmem:[%s1002_s1 + $0x30] sm:$0xff]   ;;  %v769_v31 = vld [vmem:[%s1002_s1 + $0x38] sm:$0xff]  }
   0xc   :  { %648 = vmatpush3.bf16.msra.mxu0 %v749_v10  ;;  %v766_v27 = vld [vmem:[%s1002_s1 + $0xb0] sm:$0xff]   ;;  %v770_v32 = vld [vmem:[%s1002_s1 + $0xb8] sm:$0xff]  }
   0xd   :  { %670 = vmatpush3.bf16.msra.mxu1 %v750_v11  ;;  %649 = vmatprep.subr.bf16.mxu0 %v751_v12 }
   0xe   :  { %671 = vmatprep.subr.bf16.mxu1 %v752_v13 }
  0x10   :  { %650 = vmatpush3.bf16.msra.mxu0 %v753_v14 }
  0x11   :  { %672 = vmatpush3.bf16.msra.mxu1 %v754_v15  ;;  %651 = vmatprep.subr.bf16.mxu0 %v755_v16 }
  0x12   :  { %673 = vmatprep.subr.bf16.mxu1 %v756_v17 }
  0x14   :  { %652 = vmatpush3.bf16.msra.mxu0 %v757_v18 }
  0x15   :  { %674 = vmatpush3.bf16.msra.mxu1 %v758_v19  ;;  %653 = vmatprep.subr.bf16.mxu0 %v759_v20 }
  0x16   :  { %675 = vmatprep.subr.bf16.mxu1 %v760_v21 }
  0x18   :  { %654 = vmatpush3.bf16.msra.mxu0 %v761_v22 }
  0x19   :  { %676 = vmatpush3.bf16.msra.mxu1 %v762_v23  ;;  %655 = vmatprep.subr.bf16.mxu0 %v763_v24 }
  0x1a   :  { %677 = vmatprep.subr.bf16.mxu1 %v764_v25 }
  0x1c   :  { %656 = vmatpush3.bf16.msra.mxu0 %v765_v26 }
  0x1d   :  { %678 = vmatpush3.bf16.msra.mxu1 %v766_v27  ;;  %657 = vmatprep.subr.bf16.mxu0 %v767_v28 }
  0x1e   :  { %679 = vmatprep.subr.bf16.mxu1 %v768_v29 }
  0x20   :  { %658 = vmatpush3.bf16.msra.mxu0 %v769_v31 }
  0x21   :  { %12 = vsyncpa [#allocation3], 0  ;;  %680 = vmatpush3.bf16.msra.mxu1 %v770_v32  ;;  %v800_v34 = vmov 1983009808   ;;  %v35_v36 = vshrl.u32 %v34_v30, 7  ;;  %v30_v38 = vcombine.high %v28_v33, %v28_v33  ;;  %v399_v48 = vld [vmem:[%s1004_s3] sm:$0xff] }
  0x22   :  { %v32_v35 = vunpack.c.l.s4 %v800_v34  ;;  %v400_v49 = vld [vmem:[%s1004_s3 + $0x8] sm:$0xff]  ;;  %v801_v51 = vmov 0.0|0.0   ;;  %v401_v52 = vld [vmem:[%s1004_s3 + $0x10] sm:$0xff]  ;;  %v402_v53 = vld [vmem:[%s1004_s3 + $0x18] sm:$0x3f]  ;;  %vm414_vm0 = vcmask 1045504  }
  0x23   :  { %v720_v50 = vpack.c.bf16 %v400_v49, %v399_v48  ;;  %719 = vmatprep.subr.bf16.mxu0 %v801_v51  ;;  %726 = vmatprep.subr.bf16.mxu1 %v801_v51  ;;  %v723_v54 = vpack.c.bf16 %v402_v53, %v401_v52  ;;  %vm802_vm1 = vmmov 1   ;;  %vm803_vm3 = vmmov 0   ;;  %v489_v57 = vld [vmem:[%s1006_s5] sm:$0xff]  ;;  %v490_v58 = vld [vmem:[%s1006_s5 + $0x8] sm:$0xff]  ;;  %v491_v10 = vld [vmem:[%s1006_s5 + $0x10] sm:$0xff] }
  0x24   :  { %v33_v37 = vunpack.c.0.s8 %v32_v35  ;;  %vm957_vm2 = vmpackc.low %vm414_vm0, %vm802_vm1  ;;  %v804_v56 = vmov 0.0   ;;  %v727_v59 = vpack.c.bf16 %v490_v58, %v489_v57  ;;  %v604_v62 = vld [vmem:[%s1003_s2] ss:$0 sm:$0xff]  ;;  %vm410_vm4 = vcmask 244736   ;;  %v492_v11 = vld [vmem:[%s1006_s5 + $0x18] sm:$0x3f] }
  0x25   :  { %v730_v12 = vpack.c.bf16 %v492_v11, %v491_v10  ;;  %v637_v13 = vld [vmem:[%s1005_s4] ss:$0 sm:$0xff]  ;;  %vm576_vm5 = vcmask 123904   ;;  %s805_s4 = smov [#allocation2]  }
  0x26   :  { %v36_v39 = vsub.s32 %v33_v37, %v35_v36  ;;  %v640_v18 = vld [vmem:[%s1007_s6] ss:$0 sm:$0xff]  ;;  %s596_s5 = sshll.u32 %s805_s4, 4  ;;  %s597_s5 = int_to_ptr.vmem [resolvable:$true] %s596_s5 }
  0x27   :  { %s776_s6 = scalar_lea.vmem %s597_s5, 32  ;;  %p781_p1 = scmp.lt.s32.totalorder %s597_s5, %s597_s5 }
  0x28   :  { %v37_v40 = vrot.slane %v28_v33, %v36_v39  ;;  %v44_v41 = vrot.slane %v30_v38, %v36_v39  ;;  %p777_p0 = scmp.ne.s32.totalorder %s597_s5, %s776_s6  ;;  %p782_p2 = scmp.lt.s32.totalorder %s776_s6, %s776_s6 }
  0x2a   :  { %v45_v42 = vcombine.high %v37_v40, %v37_v40  ;;  %v46_v43 = vcombine.high %v44_v41, %v44_v41  ;;  %v51_v44 = vpack.c.bf16 %v37_v40, %v37_v40  ;;  %v53_v45 = vpack.c.bf16 %v44_v41, %v44_v41  ;;  %p783_p3 = por %p782_p2, %p781_p1 }
  0x2c   :  { %v52_v46 = vpack.c.bf16 %v45_v42, %v45_v42  ;;  %v54_v47 = vpack.c.bf16 %v46_v43, %v46_v43  ;;  %p784_p4 = pnand %p783_p3, %p777_p0 }
  0x2e   :  { %350 = vmatprep.mubr.bf16.mxu0 %v52_v46  ;;  %390 = vmatprep.mubr.bf16.mxu1 %v54_v47 }
  0x2f   :  { %351 = vmatmul.mubr.bf16.vlgmr.msra.gmra.mrb[0].mxu0 %v51_v44  ;;  %391 = vmatmul.mubr.bf16.vlgmr.msra.gmra.mrb[0].mxu1 %v53_v45 }
  0x30   :  { %721 = vmatpush3.bf16.msra.mxu0 %v720_v50  ;;  %705 = vmatprep.mubr.msk.f32.mxu0 %vm803_vm3, %v804_v56 }
  0x31   :  { %722 = vmatprep.subr.bf16.mxu0 %v801_v51  ;;  %716 = vmatprep.mubr.msk.f32.mxu1 %vm803_vm3, %v804_v56 }
  0x32   :  { %728 = vmatpush3.bf16.msra.mxu1 %v727_v59 }
  0x33   :  { %729 = vmatprep.subr.bf16.mxu1 %v801_v51 }
  0x34   :  { %725 = vmatpush3.bf16.msk.msra.mxu0 %vm957_vm2, %v723_v54 }
  0x36   :  { %732 = vmatpush3.bf16.msk.msra.mxu1 %vm957_vm2, %v730_v12 }
 0x102   :  { %v659_v60 = vpop.f32.mrb[0].mxu0  ;;  %v681_v61 = vpop.f32.mrb[0].mxu1 }
 0x103   :  { %v660_v63 = vpop.f32.mrb[1].mxu0  ;;  %v682_v0 = vpop.f32.mrb[1].mxu1 }
 0x104   :  { %v661_v1 = vadd.f32 %v660_v63, %v659_v60  ;;  %v683_v2 = vadd.f32 %v682_v0, %v681_v61  ;;  %v662_v3 = vpop.f32.mrb[2].mxu0  ;;  %v684_v4 = vpop.f32.mrb[2].mxu1 }
 0x105   :  { %v663_v5 = vpop.f32.mrb[3].mxu0  ;;  %v685_v6 = vpop.f32.mrb[3].mxu1 }
 0x106   :  { %v353_v7 = vadd.f32 %v661_v1, %v604_v62 }
 0x108   :  { %v393_v8 = vadd.f32 %v683_v2, %v353_v7 }
 0x10a   :  { %v398_v9 = vmax.f32 %v393_v8, 0.0 }
 0x10c   :  { %706 = vmatmul.mubr.msk.f32.vlgmr.msra.gmra.mrb[4].mxu0 %vm410_vm4, %v398_v9 }
 0x1df   :  { %v484_v14 = vpop.f32.mrb[4].mxu0 }
 0x1e0   :  { %v485_v15 = vadd.f32 %v637_v13, %v484_v14  ;;  %v707_v16 = vpop.f32.mrb[5].mxu0 }
 0x1e2   :  { %v488_v17 = vmax.f32 %v485_v15, 0.0 }
 0x1e4   :  { %717 = vmatmul.mubr.msk.f32.vlgmr.msra.gmra.mrb[4].mxu1 %vm410_vm4, %v488_v17 }
 0x2b7   :  { %v572_v19 = vpop.f32.mrb[4].mxu1 }
 0x2b8   :  { %v573_v20 = vadd.f32 %v640_v18, %v572_v19  ;;  %v718_v21 = vpop.f32.mrb[5].mxu1 }
 0x2ba   :  { %v577_v22 = vsel %vm576_vm5, %v573_v20, -inf }
 0x2bb   :  { %578 = vmax.xlane.f32.xlu0 %v577_v22 }
 0x348   :  { %v579_v23 = vpop.xlane.xlu0 %578 }
 0x349   :  { %v580_v24 = vsub.f32 %v573_v20, %v579_v23 }
 0x34b   :  { %v581_v25 = vmul.f32 1.442695, %v580_v24 }
 0x34d   :  { %772 = vpow2.f32 %v581_v25 }
 0x357   :  { %v773_v26 = vpop.eup %772 }
 0x358   :  { %v583_v27 = vsel %vm576_vm5, %v773_v26, 0.0 }
 0x359   :  { %584 = vadd.xlane.f32.xlu0 %v583_v27 }
 0x3e6   :  { %v585_v28 = vpop.xlane.xlu0 %584 }
 0x3e7   :  { %774 = vlog2.f32 %v585_v28 }
 0x3f1   :  { %v775_v29 = vpop.eup %774 }
 0x3f2   :  { %v587_v30 = vmul.f32 0.6931472, %v775_v29 }
 0x3f4   :  { %v588_v31 = vsub.f32 %v580_v24, %v587_v30 }
 0x3f6   :  { %589 = vst.msk [vmem:[#allocation2] sm:$0x3] %vm576_vm5, %v588_v31 }
 0x3f7   :  { %787 = shalt.err (!%p784_p4)
}
 0x3f8   :  { %s788_s18 = scalar_lea.hbm %s1008_s7, 32 }
 0x3f9   :  { %p789_p5 = scmp.ne.s32.totalorder %s1008_s7, %s788_s18  ;;  %p792_p6 = scmp.lt.u32.totalorder %s788_s18, %s1008_s7 }
 0x3fb   :  { %p794_p7 = pnand %p792_p6, %p789_p5 }
 0x3fd   :  { %797 = shalt.err (!%p794_p7)
}
 0x3fe   :  { %599 = dma.vmem_to_hbm [thread:$0]  %s597_s5, 32, %s1008_s7, [#allocation3]  }
 0x3ff   :  { %798 = dma.done.wait [#allocation3], 32  }
 0x400   :  { %799 = vsyncadd [#allocation3], 4294967264 }
 0x401   :  { %603 = vsyncpa [#allocation3], 1 }

</bundles_post_ra>
